<compile_context>
chip_gen: v7x
topology: tpu7x:2x2x1
jax: 0.10.0
libtpu: 0.0.40
codegen_flags: <defaults>
</compile_context>

<pallas_src>
import functools

import jax
import jax.numpy as jnp
from jax.experimental import pallas as pl
from jax.experimental.pallas import tpu as pltpu

INPUT_SIZE = 28 * 28   # 784
LABEL_SIZE = 10
EMBED_SIZE = 2
H1 = 128
H2 = 32

B_TILE_MAX = 256

# Order in which prepared params are passed to the kernel.
PARAM_ORDER = ("we1x", "we1l", "be1",
               "we2", "be2",
               "wd1h", "wd1l", "bd1",
               "wd2", "bd2",
               "wd3", "bd3")


def cvae_kernel(x_ref, lab_ref,
                we1x_ref, we1l_ref, be1_ref,
                we2_ref, be2_ref,
                wd1h_ref, wd1l_ref, bd1_ref,
                wd2_ref, bd2_ref,
                wd3_ref, bd3_ref,
                out_ref):
    f32 = jnp.float32
    x = x_ref[...]                      # (Bt, 784) bf16
    lab = lab_ref[...]                  # (Bt, 1) int32

    # one-hot(label) built on the VPU (no HBM stream for it).
    iota = jax.lax.broadcasted_iota(jnp.int32, (lab.shape[0], LABEL_SIZE), 1)
    onehot = (lab == iota).astype(jnp.bfloat16)          # (Bt, 10)

    # ---- encoder: Linear(794,128) + ReLU (concat folded into split weights)
    h1 = (jnp.dot(x, we1x_ref[...], preferred_element_type=f32)
          + jnp.dot(onehot, we1l_ref[...], preferred_element_type=f32)
          + be1_ref[...])
    h1 = jnp.maximum(h1, 0.0).astype(jnp.bfloat16)

    # ---- encoder: Linear(128,32) + ReLU
    h2 = (jnp.dot(h1, we2_ref[...], preferred_element_type=f32)
          + be2_ref[...])
    h2 = jnp.maximum(h2, 0.0).astype(jnp.bfloat16)

    # ---- z = z_mean = h2 @ Wm + bm (eval mode), folded into decoder layer 0:
    #      relu(h2 @ (Wm @ Wd1z) + onehot @ Wd1l + (bm @ Wd1z + bd1))
    d1 = (jnp.dot(h2, wd1h_ref[...], preferred_element_type=f32)
          + jnp.dot(onehot, wd1l_ref[...], preferred_element_type=f32)
          + bd1_ref[...])
    d1 = jnp.maximum(d1, 0.0).astype(jnp.bfloat16)

    # ---- decoder: Linear(32,128) + ReLU
    d2 = (jnp.dot(d1, wd2_ref[...], preferred_element_type=f32)
          + bd2_ref[...])
    d2 = jnp.maximum(d2, 0.0).astype(jnp.bfloat16)

    # ---- decoder: Linear(128,784) + Sigmoid
    logits = (jnp.dot(d2, wd3_ref[...], preferred_element_type=f32)
              + bd3_ref[...])
    out_ref[...] = jax.nn.sigmoid(logits)


def init_params(key):
    """Deterministic PyTorch-Linear-style init (uniform +-1/sqrt(fan_in)),
    stored transposed to (in, out) for y = x @ W + b.  All float32."""
    def linear(k, fan_in, fan_out):
        kw, kb = jax.random.split(k)
        bound = 1.0 / jnp.sqrt(fan_in)
        w = jax.random.uniform(kw, (fan_in, fan_out), jnp.float32, -bound, bound)
        b = jax.random.uniform(kb, (1, fan_out), jnp.float32, -bound, bound)
        return w, b

    keys = jax.random.split(key, 7)
    # encoder[0]: Linear(784+10, 128) -> split rows into x-part / label-part
    we1, be1 = linear(keys[0], INPUT_SIZE + LABEL_SIZE, H1)
    we1x, we1l = we1[:INPUT_SIZE], we1[INPUT_SIZE:]
    # encoder[2]: Linear(128, 32)
    we2, be2 = linear(keys[1], H1, H2)
    # embed_mean: Linear(32, 2)
    wm, bm = linear(keys[2], H2, EMBED_SIZE)
    # embed_log_variance exists in the module but is unused in eval forward.
    _wlv, _blv = linear(keys[3], H2, EMBED_SIZE)
    # decoder[0]: Linear(2+10, 32) -> split rows into z-part / label-part
    wd1, bd1 = linear(keys[4], EMBED_SIZE + LABEL_SIZE, H2)
    wd1z, wd1l = wd1[:EMBED_SIZE], wd1[EMBED_SIZE:]
    # decoder[2]: Linear(32, 128)
    wd2, bd2 = linear(keys[5], H2, H1)
    # decoder[4]: Linear(128, 784)
    wd3, bd3 = linear(keys[6], H1, INPUT_SIZE)

    return dict(we1x=we1x, we1l=we1l, be1=be1,
                we2=we2, be2=be2,
                wm=wm, bm=bm,
                wd1z=wd1z, wd1l=wd1l, bd1=bd1,
                wd2=wd2, bd2=bd2,
                wd3=wd3, bd3=bd3)


def prepare_params(params):
    """Host-side prep: fold the 2-wide latent bottleneck and cast weights to
    bf16 (biases stay f32; matmuls accumulate in f32)."""
    p = params
    wd1h = p["wm"] @ p["wd1z"]                 # (32, 32): (Wm @ Wd1z)
    bd1f = p["bm"] @ p["wd1z"] + p["bd1"]      # (1, 32)
    bf16 = jnp.bfloat16
    return dict(
        we1x=p["we1x"].astype(bf16), we1l=p["we1l"].astype(bf16),
        be1=p["be1"].astype(jnp.float32),
        we2=p["we2"].astype(bf16), be2=p["be2"].astype(jnp.float32),
        wd1h=wd1h.astype(bf16), wd1l=p["wd1l"].astype(bf16),
        bd1=bd1f.astype(jnp.float32),
        wd2=p["wd2"].astype(bf16), bd2=p["bd2"].astype(jnp.float32),
        wd3=p["wd3"].astype(bf16), bd3=p["bd3"].astype(jnp.float32),
    )


def _round_up(n, m):
    return ((n + m - 1) // m) * m


@functools.partial(jax.jit, static_argnames=("b_tile",))
def cvae_forward(input_img, label, prep, *, b_tile=B_TILE_MAX):
    """input_img: (B, 1, 28, 28) float32 (NCHW), label: (B,) int32."""
    B = input_img.shape[0]
    x = input_img.reshape(B, INPUT_SIZE).astype(jnp.bfloat16)
    lab = label.reshape(B, 1).astype(jnp.int32)

    # Batch tile: >=8 (sublane), <= B_TILE_MAX; pad B up to a multiple of it.
    bt = min(b_tile, _round_up(B, 8))
    b_pad = _round_up(B, bt)
    if b_pad != B:
        x = jnp.pad(x, ((0, b_pad - B), (0, 0)))
        lab = jnp.pad(lab, ((0, b_pad - B), (0, 0)))

    row = lambda i: (i, 0)     # batch-tiled arrays
    const = lambda i: (0, 0)   # weights/biases: same block every step (resident)

    in_specs = ([pl.BlockSpec((bt, INPUT_SIZE), row),
                 pl.BlockSpec((bt, 1), row)]
                + [pl.BlockSpec(prep[k].shape, const) for k in PARAM_ORDER])
    args = (x, lab) + tuple(prep[k] for k in PARAM_ORDER)

    flops = 2 * b_pad * (INPUT_SIZE * H1 + LABEL_SIZE * H1 + H1 * H2
                         + H2 * H2 + LABEL_SIZE * H2 + H2 * H1
                         + H1 * INPUT_SIZE)
    bytes_accessed = (b_pad * INPUT_SIZE * 2      # x (bf16)
                      + b_pad * 4                 # labels
                      + b_pad * INPUT_SIZE * 4    # output (f32)
                      + sum(int(prep[k].size) * prep[k].dtype.itemsize
                            for k in PARAM_ORDER))

    recon = pl.pallas_call(
        cvae_kernel,
        out_shape=jax.ShapeDtypeStruct((b_pad, INPUT_SIZE), jnp.float32),
        grid=(b_pad // bt,),
        in_specs=in_specs,
        out_specs=pl.BlockSpec((bt, INPUT_SIZE), row),
        compiler_params=pltpu.CompilerParams(
            dimension_semantics=("parallel",)),
        cost_estimate=pl.CostEstimate(
            flops=flops,
            transcendentals=b_pad * INPUT_SIZE,
            bytes_accessed=bytes_accessed),
    )(*args)

    return recon[:B].reshape(B, 1, 28, 28)


def cvae_forward_ref(input_img, label, params):
    """Pure-JAX f32 reference of the original eval-mode forward pass."""
    B = input_img.shape[0]
    x = input_img.reshape(B, INPUT_SIZE).astype(jnp.float32)
    lab = jax.nn.one_hot(label, LABEL_SIZE, dtype=jnp.float32)
    p = params
    h1 = jnp.maximum(x @ p["we1x"] + lab @ p["we1l"] + p["be1"], 0.0)
    h2 = jnp.maximum(h1 @ p["we2"] + p["be2"], 0.0)
    z = h2 @ p["wm"] + p["bm"]
    d1 = jnp.maximum(z @ p["wd1z"] + lab @ p["wd1l"] + p["bd1"], 0.0)
    d2 = jnp.maximum(d1 @ p["wd2"] + p["bd2"], 0.0)
    rec = jax.nn.sigmoid(d2 @ p["wd3"] + p["bd3"])
    return rec.reshape(B, 1, 28, 28)


def cvae_forward_prepared_ref(input_img, label, prep):
    """Pure-JAX reference of the *same* math the kernel runs (bf16 weights,
    bf16 activations into the MXU, f32 accumulation, folded bottleneck)."""
    B = input_img.shape[0]
    f32 = jnp.float32
    x = input_img.reshape(B, INPUT_SIZE).astype(jnp.bfloat16)
    oh = jax.nn.one_hot(label, LABEL_SIZE, dtype=jnp.bfloat16)
    p = prep
    h1 = jnp.maximum(jnp.dot(x, p["we1x"], preferred_element_type=f32)
                     + jnp.dot(oh, p["we1l"], preferred_element_type=f32)
                     + p["be1"], 0.0).astype(jnp.bfloat16)
    h2 = jnp.maximum(jnp.dot(h1, p["we2"], preferred_element_type=f32)
                     + p["be2"], 0.0).astype(jnp.bfloat16)
    d1 = jnp.maximum(jnp.dot(h2, p["wd1h"], preferred_element_type=f32)
                     + jnp.dot(oh, p["wd1l"], preferred_element_type=f32)
                     + p["bd1"], 0.0).astype(jnp.bfloat16)
    d2 = jnp.maximum(jnp.dot(d1, p["wd2"], preferred_element_type=f32)
                     + p["bd2"], 0.0).astype(jnp.bfloat16)
    rec = jax.nn.sigmoid(jnp.dot(d2, p["wd3"], preferred_element_type=f32)
                         + p["bd3"])
    return rec.reshape(B, 1, 28, 28)


if __name__ == "__main__":
    key = jax.random.PRNGKey(0)
    k_param, k_x, k_lab = jax.random.split(key, 3)

    B = 8
    params = init_params(k_param)
    prep = prepare_params(params)
    input_img = jax.random.uniform(k_x, (B, 1, 28, 28), jnp.float32)  # NCHW
    label = jax.random.randint(k_lab, (B,), 0, LABEL_SIZE, jnp.int32)

    out = cvae_forward(input_img, label, prep)
    out = jax.block_until_ready(out)
    assert out.shape == (B, 1, 28, 28), out.shape

    # 1) Exact-math check: kernel vs pure-JAX version of the same bf16/fused math.
    ref_same = jax.block_until_ready(cvae_forward_prepared_ref(input_img, label, prep))
    assert jnp.allclose(out, ref_same, atol=2e-3, rtol=2e-3), \
        "mismatch vs same-math reference"

    # 2) Semantics check: kernel vs full-precision original forward (bf16 tol).
    ref_f32 = jax.block_until_ready(cvae_forward_ref(input_img, label, params))
    assert jnp.allclose(out, ref_f32, atol=3e-2, rtol=3e-2), \
        "mismatch vs f32 reference beyond bf16 tolerance"

    print("KERNEL_OK")
</pallas_src>

<mosaic_0001>
module attributes {stable_mosaic.version = 11 : i64} {
  func.func @cvae_kernel(%arg0: i32, %arg1: memref<8x784xbf16, #tpu.memory_space<vmem>>, %arg2: memref<8x1xi32, #tpu.memory_space<vmem>>, %arg3: memref<784x128xbf16, #tpu.memory_space<vmem>>, %arg4: memref<10x128xbf16, #tpu.memory_space<vmem>>, %arg5: memref<1x128xf32, #tpu.memory_space<vmem>>, %arg6: memref<128x32xbf16, #tpu.memory_space<vmem>>, %arg7: memref<1x32xf32, #tpu.memory_space<vmem>>, %arg8: memref<32x32xbf16, #tpu.memory_space<vmem>>, %arg9: memref<10x32xbf16, #tpu.memory_space<vmem>>, %arg10: memref<1x32xf32, #tpu.memory_space<vmem>>, %arg11: memref<32x128xbf16, #tpu.memory_space<vmem>>, %arg12: memref<1x128xf32, #tpu.memory_space<vmem>>, %arg13: memref<128x784xbf16, #tpu.memory_space<vmem>>, %arg14: memref<1x784xf32, #tpu.memory_space<vmem>>, %arg15: memref<8x784xf32, #tpu.memory_space<vmem>>) attributes {dimension_semantics = [#tpu.dimension_semantics<parallel>], iteration_bounds = array<i64: 1>, scalar_prefetch = 0 : i64, scratch_operands = 0 : i64, tpu.core_type = #tpu.core_type<tc>, window_params = [{transform_indices = @transform_0, window_bounds = array<i64: 8, 784>}, {transform_indices = @transform_1, window_bounds = array<i64: 8, 1>}, {pipeline_mode = #tpu.pipeline_mode<synchronous>, transform_indices = @transform_2, window_bounds = array<i64: 784, 128>}, {pipeline_mode = #tpu.pipeline_mode<synchronous>, transform_indices = @transform_3, window_bounds = array<i64: 10, 128>}, {pipeline_mode = #tpu.pipeline_mode<synchronous>, transform_indices = @transform_4, window_bounds = array<i64: 1, 128>}, {pipeline_mode = #tpu.pipeline_mode<synchronous>, transform_indices = @transform_5, window_bounds = array<i64: 128, 32>}, {pipeline_mode = #tpu.pipeline_mode<synchronous>, transform_indices = @transform_6, window_bounds = array<i64: 1, 32>}, {pipeline_mode = #tpu.pipeline_mode<synchronous>, transform_indices = @transform_7, window_bounds = array<i64: 32, 32>}, {pipeline_mode = #tpu.pipeline_mode<synchronous>, transform_indices = @transform_8, window_bounds = array<i64: 10, 32>}, {pipeline_mode = #tpu.pipeline_mode<synchronous>, transform_indices = @transform_9, window_bounds = array<i64: 1, 32>}, {pipeline_mode = #tpu.pipeline_mode<synchronous>, transform_indices = @transform_10, window_bounds = array<i64: 32, 128>}, {pipeline_mode = #tpu.pipeline_mode<synchronous>, transform_indices = @transform_11, window_bounds = array<i64: 1, 128>}, {pipeline_mode = #tpu.pipeline_mode<synchronous>, transform_indices = @transform_12, window_bounds = array<i64: 128, 784>}, {pipeline_mode = #tpu.pipeline_mode<synchronous>, transform_indices = @transform_13, window_bounds = array<i64: 1, 784>}, {transform_indices = @transform_14, window_bounds = array<i64: 8, 784>}]} {
    %c0 = arith.constant 0 : index
    %c0_0 = arith.constant 0 : index
    %0 = vector.load %arg1[%c0, %c0_0] : memref<8x784xbf16, #tpu.memory_space<vmem>>, vector<8x784xbf16>
    %c0_1 = arith.constant 0 : index
    %c0_2 = arith.constant 0 : index
    %1 = vector.load %arg2[%c0_1, %c0_2] : memref<8x1xi32, #tpu.memory_space<vmem>>, vector<8x1xi32>
    %2 = tpu.iota {dimensions = array<i32: 1>} : vector<8x10xi32>
    %3 = vector.broadcast %1 : vector<8x1xi32> to vector<8x10xi32>
    %4 = arith.cmpi eq, %3, %2 : vector<8x10xi32>
    %5 = arith.extui %4 : vector<8x10xi1> to vector<8x10xi32>
    %6 = arith.sitofp %5 : vector<8x10xi32> to vector<8x10xf32>
    %7 = arith.truncf %6 : vector<8x10xf32> to vector<8x10xbf16>
    %c0_3 = arith.constant 0 : index
    %c0_4 = arith.constant 0 : index
    %8 = vector.load %arg3[%c0_3, %c0_4] : memref<784x128xbf16, #tpu.memory_space<vmem>>, vector<784x128xbf16>
    %cst = arith.constant dense<0.000000e+00> : vector<8x128xf32>
    %9 = tpu.matmul %0, %8, %cst {dimension_numbers = #tpu.dot_dimension_numbers<[1], [0], [0], [1], [0, 0, 1, 1], [], []>} : vector<8x784xbf16>, vector<784x128xbf16>, vector<8x128xf32> -> vector<8x128xf32>
    %c0_5 = arith.constant 0 : index
    %c0_6 = arith.constant 0 : index
    %10 = vector.load %arg4[%c0_5, %c0_6] : memref<10x128xbf16, #tpu.memory_space<vmem>>, vector<10x128xbf16>
    %cst_7 = arith.constant dense<0.000000e+00> : vector<8x128xf32>
    %11 = tpu.matmul %7, %10, %cst_7 {dimension_numbers = #tpu.dot_dimension_numbers<[1], [0], [0], [1], [0, 0, 1, 1], [], []>} : vector<8x10xbf16>, vector<10x128xbf16>, vector<8x128xf32> -> vector<8x128xf32>
    %12 = arith.addf %9, %11 : vector<8x128xf32>
    %c0_8 = arith.constant 0 : index
    %c0_9 = arith.constant 0 : index
    %13 = vector.load %arg5[%c0_8, %c0_9] : memref<1x128xf32, #tpu.memory_space<vmem>>, vector<1x128xf32>
    %14 = vector.broadcast %13 : vector<1x128xf32> to vector<8x128xf32>
    %15 = arith.addf %12, %14 : vector<8x128xf32>
    %cst_10 = arith.constant 0.000000e+00 : f32
    %16 = vector.broadcast %cst_10 : f32 to vector<8x128xf32>
    %17 = arith.maximumf %15, %16 : vector<8x128xf32>
    %18 = arith.truncf %17 : vector<8x128xf32> to vector<8x128xbf16>
    %c0_11 = arith.constant 0 : index
    %c0_12 = arith.constant 0 : index
    %19 = vector.load %arg6[%c0_11, %c0_12] : memref<128x32xbf16, #tpu.memory_space<vmem>>, vector<128x32xbf16>
    %cst_13 = arith.constant dense<0.000000e+00> : vector<8x32xf32>
    %20 = tpu.matmul %18, %19, %cst_13 {dimension_numbers = #tpu.dot_dimension_numbers<[1], [0], [0], [1], [0, 0, 1, 1], [], []>} : vector<8x128xbf16>, vector<128x32xbf16>, vector<8x32xf32> -> vector<8x32xf32>
    %c0_14 = arith.constant 0 : index
    %c0_15 = arith.constant 0 : index
    %21 = vector.load %arg7[%c0_14, %c0_15] : memref<1x32xf32, #tpu.memory_space<vmem>>, vector<1x32xf32>
    %22 = vector.broadcast %21 : vector<1x32xf32> to vector<8x32xf32>
    %23 = arith.addf %20, %22 : vector<8x32xf32>
    %cst_16 = arith.constant 0.000000e+00 : f32
    %24 = vector.broadcast %cst_16 : f32 to vector<8x32xf32>
    %25 = arith.maximumf %23, %24 : vector<8x32xf32>
    %26 = arith.truncf %25 : vector<8x32xf32> to vector<8x32xbf16>
    %c0_17 = arith.constant 0 : index
    %c0_18 = arith.constant 0 : index
    %27 = vector.load %arg8[%c0_17, %c0_18] : memref<32x32xbf16, #tpu.memory_space<vmem>>, vector<32x32xbf16>
    %cst_19 = arith.constant dense<0.000000e+00> : vector<8x32xf32>
    %28 = tpu.matmul %26, %27, %cst_19 {dimension_numbers = #tpu.dot_dimension_numbers<[1], [0], [0], [1], [0, 0, 1, 1], [], []>} : vector<8x32xbf16>, vector<32x32xbf16>, vector<8x32xf32> -> vector<8x32xf32>
    %c0_20 = arith.constant 0 : index
    %c0_21 = arith.constant 0 : index
    %29 = vector.load %arg9[%c0_20, %c0_21] : memref<10x32xbf16, #tpu.memory_space<vmem>>, vector<10x32xbf16>
    %cst_22 = arith.constant dense<0.000000e+00> : vector<8x32xf32>
    %30 = tpu.matmul %7, %29, %cst_22 {dimension_numbers = #tpu.dot_dimension_numbers<[1], [0], [0], [1], [0, 0, 1, 1], [], []>} : vector<8x10xbf16>, vector<10x32xbf16>, vector<8x32xf32> -> vector<8x32xf32>
    %31 = arith.addf %28, %30 : vector<8x32xf32>
    %c0_23 = arith.constant 0 : index
    %c0_24 = arith.constant 0 : index
    %32 = vector.load %arg10[%c0_23, %c0_24] : memref<1x32xf32, #tpu.memory_space<vmem>>, vector<1x32xf32>
    %33 = vector.broadcast %32 : vector<1x32xf32> to vector<8x32xf32>
    %34 = arith.addf %31, %33 : vector<8x32xf32>
    %cst_25 = arith.constant 0.000000e+00 : f32
    %35 = vector.broadcast %cst_25 : f32 to vector<8x32xf32>
    %36 = arith.maximumf %34, %35 : vector<8x32xf32>
    %37 = arith.truncf %36 : vector<8x32xf32> to vector<8x32xbf16>
    %c0_26 = arith.constant 0 : index
    %c0_27 = arith.constant 0 : index
    %38 = vector.load %arg11[%c0_26, %c0_27] : memref<32x128xbf16, #tpu.memory_space<vmem>>, vector<32x128xbf16>
    %cst_28 = arith.constant dense<0.000000e+00> : vector<8x128xf32>
    %39 = tpu.matmul %37, %38, %cst_28 {dimension_numbers = #tpu.dot_dimension_numbers<[1], [0], [0], [1], [0, 0, 1, 1], [], []>} : vector<8x32xbf16>, vector<32x128xbf16>, vector<8x128xf32> -> vector<8x128xf32>
    %c0_29 = arith.constant 0 : index
    %c0_30 = arith.constant 0 : index
    %40 = vector.load %arg12[%c0_29, %c0_30] : memref<1x128xf32, #tpu.memory_space<vmem>>, vector<1x128xf32>
    %41 = vector.broadcast %40 : vector<1x128xf32> to vector<8x128xf32>
    %42 = arith.addf %39, %41 : vector<8x128xf32>
    %cst_31 = arith.constant 0.000000e+00 : f32
    %43 = vector.broadcast %cst_31 : f32 to vector<8x128xf32>
    %44 = arith.maximumf %42, %43 : vector<8x128xf32>
    %45 = arith.truncf %44 : vector<8x128xf32> to vector<8x128xbf16>
    %c0_32 = arith.constant 0 : index
    %c0_33 = arith.constant 0 : index
    %46 = vector.load %arg13[%c0_32, %c0_33] : memref<128x784xbf16, #tpu.memory_space<vmem>>, vector<128x784xbf16>
    %cst_34 = arith.constant dense<0.000000e+00> : vector<8x784xf32>
    %47 = tpu.matmul %45, %46, %cst_34 {dimension_numbers = #tpu.dot_dimension_numbers<[1], [0], [0], [1], [0, 0, 1, 1], [], []>} : vector<8x128xbf16>, vector<128x784xbf16>, vector<8x784xf32> -> vector<8x784xf32>
    %c0_35 = arith.constant 0 : index
    %c0_36 = arith.constant 0 : index
    %48 = vector.load %arg14[%c0_35, %c0_36] : memref<1x784xf32, #tpu.memory_space<vmem>>, vector<1x784xf32>
    %49 = vector.broadcast %48 : vector<1x784xf32> to vector<8x784xf32>
    %50 = arith.addf %47, %49 : vector<8x784xf32>
    %51 = arith.negf %50 : vector<8x784xf32>
    %52 = math.exp %51 : vector<8x784xf32>
    %cst_37 = arith.constant 1.000000e+00 : f32
    %53 = vector.broadcast %cst_37 : f32 to vector<8x784xf32>
    %54 = arith.addf %53, %52 : vector<8x784xf32>
    %55 = arith.divf %53, %54 : vector<8x784xf32>
    %c0_38 = arith.constant 0 : index
    %c0_39 = arith.constant 0 : index
    %56 = vector.load %arg15[%c0_38, %c0_39] : memref<8x784xf32, #tpu.memory_space<vmem>>, vector<8x784xf32>
    tpu.vector_store %arg15[%c0_38, %c0_39], %55 {strides = array<i32>} : memref<8x784xf32, #tpu.memory_space<vmem>>, vector<8x784xf32>,
    return
  }
  func.func @transform_0(%arg0: i32) -> (i32, i32) {
    %c0_i32 = arith.constant 0 : i32
    %c0_i32_0 = arith.constant 0 : i32
    return %arg0, %c0_i32 : i32, i32
  }
  func.func @transform_1(%arg0: i32) -> (i32, i32) {
    %c0_i32 = arith.constant 0 : i32
    %c0_i32_0 = arith.constant 0 : i32
    return %arg0, %c0_i32 : i32, i32
  }
  func.func @transform_2(%arg0: i32) -> (i32, i32) {
    %c0_i32 = arith.constant 0 : i32
    %c0_i32_0 = arith.constant 0 : i32
    %c0_i32_1 = arith.constant 0 : i32
    return %c0_i32, %c0_i32_0 : i32, i32
  }
  func.func @transform_3(%arg0: i32) -> (i32, i32) {
    %c0_i32 = arith.constant 0 : i32
    %c0_i32_0 = arith.constant 0 : i32
    %c0_i32_1 = arith.constant 0 : i32
    return %c0_i32, %c0_i32_0 : i32, i32
  }
  func.func @transform_4(%arg0: i32) -> (i32, i32) {
    %c0_i32 = arith.constant 0 : i32
    %c0_i32_0 = arith.constant 0 : i32
    %c0_i32_1 = arith.constant 0 : i32
    return %c0_i32, %c0_i32_0 : i32, i32
  }
  func.func @transform_5(%arg0: i32) -> (i32, i32) {
    %c0_i32 = arith.constant 0 : i32
    %c0_i32_0 = arith.constant 0 : i32
    %c0_i32_1 = arith.constant 0 : i32
    return %c0_i32, %c0_i32_0 : i32, i32
  }
  func.func @transform_6(%arg0: i32) -> (i32, i32) {
    %c0_i32 = arith.constant 0 : i32
    %c0_i32_0 = arith.constant 0 : i32
    %c0_i32_1 = arith.constant 0 : i32
    return %c0_i32, %c0_i32_0 : i32, i32
  }
  func.func @transform_7(%arg0: i32) -> (i32, i32) {
    %c0_i32 = arith.constant 0 : i32
    %c0_i32_0 = arith.constant 0 : i32
    %c0_i32_1 = arith.constant 0 : i32
    return %c0_i32, %c0_i32_0 : i32, i32
  }
  func.func @transform_8(%arg0: i32) -> (i32, i32) {
    %c0_i32 = arith.constant 0 : i32
    %c0_i32_0 = arith.constant 0 : i32
    %c0_i32_1 = arith.constant 0 : i32
    return %c0_i32, %c0_i32_0 : i32, i32
  }
  func.func @transform_9(%arg0: i32) -> (i32, i32) {
    %c0_i32 = arith.constant 0 : i32
    %c0_i32_0 = arith.constant 0 : i32
    %c0_i32_1 = arith.constant 0 : i32
    return %c0_i32, %c0_i32_0 : i32, i32
  }
  func.func @transform_10(%arg0: i32) -> (i32, i32) {
    %c0_i32 = arith.constant 0 : i32
    %c0_i32_0 = arith.constant 0 : i32
    %c0_i32_1 = arith.constant 0 : i32
    return %c0_i32, %c0_i32_0 : i32, i32
  }
  func.func @transform_11(%arg0: i32) -> (i32, i32) {
    %c0_i32 = arith.constant 0 : i32
    %c0_i32_0 = arith.constant 0 : i32
    %c0_i32_1 = arith.constant 0 : i32
    return %c0_i32, %c0_i32_0 : i32, i32
  }
  func.func @transform_12(%arg0: i32) -> (i32, i32) {
    %c0_i32 = arith.constant 0 : i32
    %c0_i32_0 = arith.constant 0 : i32
    %c0_i32_1 = arith.constant 0 : i32
    return %c0_i32, %c0_i32_0 : i32, i32
  }
  func.func @transform_13(%arg0: i32) -> (i32, i32) {
    %c0_i32 = arith.constant 0 : i32
    %c0_i32_0 = arith.constant 0 : i32
    %c0_i32_1 = arith.constant 0 : i32
    return %c0_i32, %c0_i32_0 : i32, i32
  }
  func.func @transform_14(%arg0: i32) -> (i32, i32) {
    %c0_i32 = arith.constant 0 : i32
    %c0_i32_0 = arith.constant 0 : i32
    return %arg0, %c0_i32 : i32, i32
  }
}

</mosaic_0001>

<bundles_post_ra>
// kernel: cvae_forward.1
= control target key start
LH: loop header
LB: loop body
LE: loop exit
PB: predicated region body
PF: predicated region fallthrough
CT: control target
= control target key end

     0   :  { %v2108_v0 = vmov 0   ;;  %v2109_v2 = vmov 0.0   ;;  %vm2110_vm0 = vmmov 0   ;;  %vm171_vm1 = vcmask 1044480   ;;  %s2647_s1 = inlined_call_operand.vmem [shape: s32[8,1], index: 1, kind: input, shape index: {}]   ;;  %s2648_s2 = inlined_call_operand.vmem [shape: bf16[784,128], index: 2, kind: input, shape index: {}]   ;;  %s2649_s0 = inlined_call_operand.vmem [shape: bf16[8,784], index: 0, kind: input, shape index: {}]   ;;  %s2650_s3 = inlined_call_operand.vmem [shape: bf16[10,128], index: 3, kind: input, shape index: {}]   ;;  %s2651_s8 = inlined_call_operand.vmem [shape: bf16[10,32], index: 8, kind: input, shape index: {}]   ;;  %s2652_s5 = inlined_call_operand.vmem [shape: bf16[128,32], index: 5, kind: input, shape index: {}]   ;;  %s2653_s4 = inlined_call_operand.vmem [shape: f32[1,128], index: 4, kind: input, shape index: {}]   ;;  %s2654_s7 = inlined_call_operand.vmem [shape: bf16[32,32], index: 7, kind: input, shape index: {}]   ;;  %s2655_s6 = inlined_call_operand.vmem [shape: f32[1,32], index: 6, kind: input, shape index: {}]   ;;  %s2656_s10 = inlined_call_operand.vmem [shape: bf16[32,128], index: 10, kind: input, shape index: {}]   ;;  %s2657_s12 = inlined_call_operand.vmem [shape: bf16[128,784], index: 12, kind: input, shape index: {}]   ;;  %s2658_s9 = inlined_call_operand.vmem [shape: f32[1,32], index: 9, kind: input, shape index: {}]   ;;  %s2659_s11 = inlined_call_operand.vmem [shape: f32[1,128], index: 11, kind: input, shape index: {}]   ;;  %s2660_s13 = inlined_call_operand.vmem [shape: f32[1,784], index: 13, kind: input, shape index: {}]   ;;  %s2661_s14 = inlined_call_operand.vmem [shape: f32[8,784], index: 14, kind: output, shape index: {}]  }
   0x1   :  { %1929 = vset.pattern.permute.xlu0 %v2108_v0  ;;  %v52_v1 = vld [vmem:[%s2647_s1] sm:$0xff]  ;;  %1852 = vmatprep.subr.bf16.mxu0 %v2109_v2  ;;  %v1932_v5 = vld [vmem:[%s2648_s2 + $0x48] sm:$0xff]   ;;  %v1934_v7 = vld [vmem:[%s2648_s2 + $0x50] sm:$0xff]   ;;  %v53_v46 = vlaneseq  ;;  %vm167_vm3 = vcmask 80896   ;;  %vm533_vm4 = vcmask 130048   ;;  %vm886_vm5 = vcmask 261120  }
   0x2   :  { %56 = vperm.xlu0 %1929, %v52_v1   ;;  %v1930_v3 = vld [vmem:[%s2648_s2 + $0x40] sm:$0xff]   ;;  %v1933_v6 = vld [vmem:[%s2648_s2 + $0x8] sm:$0xff]   ;;  %1854 = vmatprep.mubr.msk.bf16.mxu0 %vm2110_vm0, %v2109_v2  ;;  %v1935_v8 = vld [vmem:[%s2648_s2 + $0x10] sm:$0xff]  }
   0x3   :  { %v1931_v4 = vld [vmem:[%s2648_s2] sm:$0xff]   ;;  %1758 = vmatprep.subr.bf16.mxu1 %v1930_v3  ;;  %v1936_v9 = vld [vmem:[%s2648_s2 + $0x58] sm:$0xff]   ;;  %v1940_v14 = vld [vmem:[%s2648_s2 + $0x68] sm:$0xff]   ;;  %v54_v47 = vand.u32 127, %v53_v46 }
   0x4   :  { %1759 = vmatpush3.bf16.msra.mxu1 %v1931_v4  ;;  %v1937_v10 = vld [vmem:[%s2648_s2 + $0x18] sm:$0xff]   ;;  %v1938_v11 = vld [vmem:[%s2648_s2 + $0x60] sm:$0xff]   ;;  %v1941_v16 = vld [vmem:[%s2648_s2 + $0x28] sm:$0xff]  }
   0x5   :  { %1760 = vmatprep.subr.bf16.mxu1 %v1932_v5  ;;  %v1939_v12 = vld [vmem:[%s2648_s2 + $0x20] sm:$0xff]   ;;  %v1942_v17 = vld [vmem:[%s2648_s2 + $0x70] sm:$0xff]   ;;  %v1944_v19 = vld [vmem:[%s2648_s2 + $0x78] sm:$0xff]  }
   0x6   :  { %v48_v13 = vld [vmem:[%s2649_s0] sm:$0xff]  ;;  %v1943_v18 = vld [vmem:[%s2648_s2 + $0x30] sm:$0xff]   ;;  %v1945_v20 = vld [vmem:[%s2648_s2 + $0x38] sm:$0xff]  }
   0x7   :  { %v1617_v15 = vcombine.high %v48_v13, %v48_v13  ;;  %v1949_v21 = vld [vmem:[%s2648_s2 + $0x140] sm:$0xff]   ;;  %v1616_v22 = vcombine.low %v48_v13, %v48_v13  ;;  %v1951_v24 = vld [vmem:[%s2648_s2 + $0x148] sm:$0xff]   ;;  %v50_v25 = vld [vmem:[%s2649_s0 + $0x10] sm:$0xff] }
   0x8   :  { %1761 = vmatpush3.bf16.msra.mxu1 %v1933_v6  ;;  %v1950_v23 = vld [vmem:[%s2648_s2 + $0x100] sm:$0xff]   ;;  %v1621_v26 = vcombine.high %v50_v25, %v50_v25  ;;  %v1952_v28 = vld [vmem:[%s2648_s2 + $0x108] sm:$0xff]   ;;  %v1953_v31 = vld [vmem:[%s2648_s2 + $0x150] sm:$0xff]   ;;  %v1620_v44 = vcombine.low %v50_v25, %v50_v25 }
   0x9   :  { %1762 = vmatprep.subr.bf16.mxu1 %v1934_v7  ;;  %569 = vmatprep.mubr.bf16.mxu1 %v1617_v15  ;;  %v1967_v27 = vld [vmem:[%s2650_s3] sm:$0x1f]   ;;  %v1954_v32 = vld [vmem:[%s2648_s2 + $0x110] sm:$0xff]   ;;  %v1955_v33 = vld [vmem:[%s2648_s2 + $0x158] sm:$0xff]  }
   0xa   :  { %v173_v29 = vsel %vm171_vm1, %v1967_v27, 0  ;;  %v1969_v30 = vld [vmem:[%s2648_s2 + $0xc0] sm:$0xff]   ;;  %v1956_v34 = vld [vmem:[%s2648_s2 + $0x118] sm:$0xff]   ;;  %v1959_v37 = vld [vmem:[%s2648_s2 + $0x168] sm:$0xff]  }
   0xb   :  { %1853 = vmatpush3.bf16.msra.mxu0 %v173_v29  ;;  %v1957_v35 = vld [vmem:[%s2648_s2 + $0x160] sm:$0xff]   ;;  %v1960_v38 = vld [vmem:[%s2648_s2 + $0x128] sm:$0xff]   ;;  %v1961_v39 = vld [vmem:[%s2648_s2 + $0x170] sm:$0xff]  }
   0xc   :  { %1763 = vmatpush3.bf16.msra.mxu1 %v1935_v8  ;;  %1780 = vmatprep.subr.bf16.mxu0 %v1969_v30  ;;  %v1958_v36 = vld [vmem:[%s2648_s2 + $0x120] sm:$0xff]   ;;  %v1962_v40 = vld [vmem:[%s2648_s2 + $0x130] sm:$0xff]   ;;  %v1963_v41 = vld [vmem:[%s2648_s2 + $0x178] sm:$0xff]  }
   0xd   :  { %1764 = vmatprep.subr.bf16.mxu1 %v1936_v9  ;;  %v1964_v42 = vld [vmem:[%s2648_s2 + $0x138] sm:$0xff]   ;;  %v1968_v43 = vld [vmem:[%s2651_s8] sm:$0x1f]   ;;  %v49_v48 = vld [vmem:[%s2649_s0 + $0x8] sm:$0xff] }
   0xe   :  { %v832_v45 = vsel %vm171_vm1, %v1968_v43, 0  ;;  %v1970_v51 = vld [vmem:[%s2648_s2 + $0x80] sm:$0xff]   ;;  %v1619_v52 = vcombine.high %v49_v48, %v49_v48  ;;  %v1971_v54 = vld [vmem:[%s2648_s2 + $0xc8] sm:$0xff]   ;;  %v1973_v56 = vld [vmem:[%s2648_s2 + $0xd0] sm:$0xff]   ;;  %v1618_v6 = vcombine.low %v49_v48, %v49_v48 }
   0xf   :  { %v1972_v55 = vld [vmem:[%s2648_s2 + $0x88] sm:$0xff]   ;;  %v1974_v57 = vld [vmem:[%s2648_s2 + $0x90] sm:$0xff]   ;;  %v1975_v58 = vld [vmem:[%s2648_s2 + $0xd8] sm:$0xff]  }
  0x10   :  { %1765 = vmatpush3.bf16.msra.mxu1 %v1937_v10  ;;  %v1976_v59 = vld [vmem:[%s2648_s2 + $0x98] sm:$0xff]   ;;  %v1977_v60 = vld [vmem:[%s2648_s2 + $0xe0] sm:$0xff]   ;;  %v1979_v62 = vld [vmem:[%s2648_s2 + $0xe8] sm:$0xff]  }
  0x11   :  { %1766 = vmatprep.subr.bf16.mxu1 %v1938_v11  ;;  %v1978_v61 = vld [vmem:[%s2648_s2 + $0xa0] sm:$0xff]   ;;  %v1980_v63 = vld [vmem:[%s2648_s2 + $0xa8] sm:$0xff]   ;;  %v1981_v1 = vld [vmem:[%s2648_s2 + $0xf0] sm:$0xff]  }
  0x12   :  { %v1982_v3 = vld [vmem:[%s2648_s2 + $0xb0] sm:$0xff]   ;;  %v1983_v4 = vld [vmem:[%s2648_s2 + $0xf8] sm:$0xff]   ;;  %v1987_v7 = vld [vmem:[%s2648_s2 + $0x180] sm:$0xff]  }
  0x13   :  { %v1984_v5 = vld [vmem:[%s2648_s2 + $0xb8] sm:$0xff]   ;;  %v1988_v9 = vld [vmem:[%s2652_s5] sm:$0xff]   ;;  %v1989_v10 = vld [vmem:[%s2652_s5 + $0x8] sm:$0xff]  }
  0x14   :  { %1767 = vmatpush3.bf16.msra.mxu1 %v1939_v12  ;;  %v1948_v8 = vld [vmem:[%s2649_s0 + $0x18] ss:$0 sps:$4 sm:$0xff]   ;;  %v1990_v11 = vld [vmem:[%s2652_s5 + $0x10] sm:$0xff]  }
  0x15   :  { %1768 = vmatprep.subr.bf16.mxu1 %v1940_v14  ;;  %v1991_v12 = vld [vmem:[%s2652_s5 + $0x18] sm:$0xff]  }
  0x18   :  { %1769 = vmatpush3.bf16.msra.mxu1 %v1941_v16 }
  0x19   :  { %1770 = vmatprep.subr.bf16.mxu1 %v1942_v17  ;;  %v1992_v17 = vld [vmem:[%s2652_s5 + $0x20] sm:$0xff]  }
  0x1c   :  { %1771 = vmatpush3.bf16.msra.mxu1 %v1943_v18 }
  0x1d   :  { %1772 = vmatprep.subr.bf16.mxu1 %v1944_v19  ;;  %v1993_v19 = vld [vmem:[%s2652_s5 + $0x28] sm:$0xff]  }
  0x20   :  { %1773 = vmatpush3.bf16.msra.mxu1 %v1945_v20  ;;  %v1994_v20 = vld [vmem:[%s2652_s5 + $0x30] sm:$0xff]  }
  0x21   :  { %1802 = vmatprep.subr.bf16.mxu1 %v1949_v21  ;;  %v1995_v21 = vld [vmem:[%s2652_s5 + $0x38] sm:$0xff]  }
  0x23   :  { %570 = vmatmul.mubr.bf16.vlgmr.msra.gmra.mrb[0].mxu1 %v1616_v22 }
  0x24   :  { %1803 = vmatpush3.bf16.msra.mxu1 %v1950_v23  ;;  %649 = vmatprep.mubr.bf16.mxu1 %v1621_v26 }
  0x25   :  { %1804 = vmatprep.subr.bf16.mxu1 %v1951_v24 }
  0x28   :  { %1805 = vmatpush3.bf16.msra.mxu1 %v1952_v28 }
  0x29   :  { %1806 = vmatprep.subr.bf16.mxu1 %v1953_v31 }
  0x2c   :  { %1807 = vmatpush3.bf16.msra.mxu1 %v1954_v32 }
  0x2d   :  { %1808 = vmatprep.subr.bf16.mxu1 %v1955_v33 }
  0x30   :  { %1809 = vmatpush3.bf16.msra.mxu1 %v1956_v34 }
  0x31   :  { %1810 = vmatprep.subr.bf16.mxu1 %v1957_v35 }
  0x34   :  { %1811 = vmatpush3.bf16.msra.mxu1 %v1958_v36 }
  0x35   :  { %1812 = vmatprep.subr.bf16.mxu1 %v1959_v37 }
  0x38   :  { %1813 = vmatpush3.bf16.msra.mxu1 %v1960_v38 }
  0x39   :  { %1814 = vmatprep.subr.bf16.mxu1 %v1961_v39 }
  0x3c   :  { %1815 = vmatpush3.bf16.msra.mxu1 %v1962_v40 }
  0x3d   :  { %1816 = vmatprep.subr.bf16.mxu1 %v1963_v41 }
  0x40   :  { %1817 = vmatpush3.bf16.msra.mxu1 %v1964_v42 }
  0x41   :  { %1884 = vmatprep.subr.bf16.mxu1 %v2109_v2 }
  0x43   :  { %650 = vmatmul.mubr.bf16.vlgmr.msra.gmra.mrb[4].mxu1 %v1620_v44  ;;  %v1673_v44 = vld [vmem:[%s2653_s4] ss:$0 sm:$0xff] }
  0x44   :  { %1885 = vmatpush3.bf16.msra.mxu1 %v832_v45  ;;  %1886 = vmatprep.mubr.msk.bf16.mxu1 %vm2110_vm0, %v2109_v2 }
  0x45   :  { %1890 = vmatprep.subr.bf16.mxu1 %v2109_v2 }
  0x81   :  { %v57_v49 = vpop.permute.xlu0 %56 }
  0x82   :  { %vm58_vm2 = vcmp.eq.s32.totalorder %v57_v49, %v54_v47 }
  0x83   :  { %v1613_v50 = vsel %vm58_vm2, 1.0, %v2109_v2 }
  0x84   :  { %v61_v53 = vpack.c.bf16 %v1613_v50, %v1613_v50 }
  0x86   :  { %1855 = vmatmul.mubr.msk.bf16.vlgmr.msra.gmra.mrb[0].mxu0 %vm167_vm3, %v61_v53  ;;  %1887 = vmatmul.mubr.msk.bf16.vlgmr.msra.gmra.mrb[8].mxu1 %vm167_vm3, %v61_v53  ;;  %v1996_v53 = vld [vmem:[%s2654_s7] sm:$0xff]  }
  0x87   :  { %1781 = vmatpush3.bf16.msra.mxu0 %v1970_v51  ;;  %609 = vmatprep.mubr.bf16.mxu0 %v1619_v52 }
  0x88   :  { %1782 = vmatprep.subr.bf16.mxu0 %v1971_v54  ;;  %1894 = vmatprep.mubr.msk.bf16.mxu1 %vm2110_vm0, %v2109_v2  ;;  %v1997_v54 = vld [vmem:[%s2654_s7 + $0x8] sm:$0xff]  }
  0x89   :  { %1891 = vmatpush3.bf16.msra.mxu1 %v1996_v53  ;;  %v2048_v53 = vld [vmem:[%s2657_s12 + $0x10] ss:$28 sps:$4 sm:$0xff]  }
  0x8a   :  { %1892 = vmatprep.subr.bf16.mxu1 %v2109_v2 }
  0x8b   :  { %1783 = vmatpush3.bf16.msra.mxu0 %v1972_v55  ;;  %v1674_v55 = vld [vmem:[%s2655_s6] ss:$0 sm:$0xff] }
  0x8c   :  { %1784 = vmatprep.subr.bf16.mxu0 %v1973_v56 }
  0x8d   :  { %1893 = vmatpush3.bf16.msra.mxu1 %v1997_v54  ;;  %v2051_v54 = vld [vmem:[%s2657_s12 + $0x18] ss:$28 sps:$4 sm:$0xff]  }
  0x8f   :  { %1785 = vmatpush3.bf16.msra.mxu0 %v1974_v57 }
  0x90   :  { %1786 = vmatprep.subr.bf16.mxu0 %v1975_v58 }
  0x93   :  { %1787 = vmatpush3.bf16.msra.mxu0 %v1976_v59 }
  0x94   :  { %1788 = vmatprep.subr.bf16.mxu0 %v1977_v60 }
  0x97   :  { %1789 = vmatpush3.bf16.msra.mxu0 %v1978_v61 }
  0x98   :  { %1790 = vmatprep.subr.bf16.mxu0 %v1979_v62 }
  0x9b   :  { %1791 = vmatpush3.bf16.msra.mxu0 %v1980_v63  ;;  %v1998_v63 = vld [vmem:[%s2656_s10] sm:$0xff]  }
  0x9c   :  { %1792 = vmatprep.subr.bf16.mxu0 %v1981_v1  ;;  %v1999_v1 = vld [vmem:[%s2656_s10 + $0x8] sm:$0xff]  }
  0x9f   :  { %1793 = vmatpush3.bf16.msra.mxu0 %v1982_v3  ;;  %v2000_v3 = vld [vmem:[%s2657_s12] ss:$28 sps:$4 sm:$0xff]  }
  0xa0   :  { %1794 = vmatprep.subr.bf16.mxu0 %v1983_v4  ;;  %v2002_v4 = vld [vmem:[%s2657_s12 + $0x4] ss:$28 sps:$4 sm:$0xff]  }
  0xa1   :  { %1397 = vmatprep.subr.bf16.mxu1 %v2002_v4  ;;  %v2067_v4 = vld [vmem:[%s2657_s12 + $0xf8] ss:$28 sps:$4 sm:$0xff]  }
  0xa3   :  { %1795 = vmatpush3.bf16.msra.mxu0 %v1984_v5  ;;  %v2005_v5 = vld [vmem:[%s2657_s12 + $0xc] ss:$28 sps:$4 sm:$0xff]  }
  0xa4   :  { %1858 = vmatprep.subr.bf16.mxu0 %v2109_v2 }
  0xa6   :  { %610 = vmatmul.mubr.bf16.vlgmr.msra.gmra.mrb[4].mxu0 %v1618_v6  ;;  %v2008_v6 = vld [vmem:[%s2657_s12 + $0x3c] ss:$28 sps:$4 sm:$0xff]  }
  0xa7   :  { %1859 = vmatpush3.bf16.msra.mxu0 %v1987_v7  ;;  %1860 = vmatprep.mubr.msk.bf16.mxu0 %vm2110_vm0, %v2109_v2  ;;  %v2006_v7 = vld [vmem:[%s2657_s12 + $0x38] ss:$28 sps:$4 sm:$0xff]  }
  0xa8   :  { %1864 = vmatprep.subr.bf16.mxu0 %v2109_v2 }
  0xae   :  { %1861 = vmatmul.mubr.msk.bf16.vlgmr.msra.gmra.mrb[8].mxu0 %vm533_vm4, %v1948_v8  ;;  %v2014_v8 = vld [vmem:[%s2657_s12 + $0x74] ss:$28 sps:$4 sm:$0xff]  }
  0xaf   :  { %1880 = vmatprep.mubr.msk.bf16.mxu0 %vm2110_vm0, %v2109_v2  ;;  %1865 = vmatpush3.bf16.msra.mxu0 %v1988_v9  ;;  %v2012_v9 = vld [vmem:[%s2657_s12 + $0x70] ss:$28 sps:$4 sm:$0xff]  }
  0xb0   :  { %1866 = vmatprep.subr.bf16.mxu0 %v2109_v2 }
  0xb3   :  { %1867 = vmatpush3.bf16.msra.mxu0 %v1989_v10  ;;  %v2020_v10 = vld [vmem:[%s2657_s12 + $0xac] ss:$28 sps:$4 sm:$0xff]  }
  0xb4   :  { %1868 = vmatprep.subr.bf16.mxu0 %v2109_v2 }
  0xb7   :  { %1869 = vmatpush3.bf16.msra.mxu0 %v1990_v11  ;;  %v2018_v11 = vld [vmem:[%s2657_s12 + $0xa8] ss:$28 sps:$4 sm:$0xff]  }
  0xb8   :  { %1870 = vmatprep.subr.bf16.mxu0 %v2109_v2 }
  0xbb   :  { %1871 = vmatpush3.bf16.msra.mxu0 %v1991_v12  ;;  %v2026_v12 = vld [vmem:[%s2657_s12 + $0xe4] ss:$28 sps:$4 sm:$0xff]  }
  0xbc   :  { %1872 = vmatprep.subr.bf16.mxu0 %v2109_v2 }
  0xbf   :  { %1873 = vmatpush3.bf16.msra.mxu0 %v1992_v17  ;;  %v2036_v17 = vld [vmem:[%s2657_s12 + $0x150] ss:$28 sps:$4 sm:$0xff]  }
  0xc0   :  { %1874 = vmatprep.subr.bf16.mxu0 %v2109_v2 }
  0xc3   :  { %1875 = vmatpush3.bf16.msra.mxu0 %v1993_v19  ;;  %v1688_v19 = vld [vmem:[%s2658_s9] ss:$0 sm:$0xff] }
  0xc4   :  { %1876 = vmatprep.subr.bf16.mxu0 %v2109_v2 }
  0xc7   :  { %1877 = vmatpush3.bf16.msra.mxu0 %v1994_v20 }
  0xc8   :  { %1878 = vmatprep.subr.bf16.mxu0 %v2109_v2 }
  0xcb   :  { %1879 = vmatpush3.bf16.msra.mxu0 %v1995_v21 }
  0xcc   :  { %1898 = vmatprep.subr.bf16.mxu0 %v2109_v2 }
  0xf6   :  { %v1774_v13 = vpop.f32.mrb[0].mxu1 }
  0xf7   :  { %v1775_v14 = vpop.f32.mrb[1].mxu1 }
  0xf8   :  { %v1776_v15 = vadd.f32 %v1775_v14, %v1774_v13  ;;  %v1777_v16 = vpop.f32.mrb[2].mxu1  ;;  %v2024_v13 = vld [vmem:[%s2657_s12 + $0xe0] ss:$28 sps:$4 sm:$0xff]  }
  0xf9   :  { %v1778_v18 = vpop.f32.mrb[3].mxu1  ;;  %v2032_v14 = vld [vmem:[%s2657_s12 + $0x11c] ss:$28 sps:$4 sm:$0xff]   ;;  %v2038_v16 = vld [vmem:[%s2657_s12 + $0x154] ss:$28 sps:$4 sm:$0xff]  }
 0x116   :  { %v1818_v22 = vpop.f32.mrb[4].mxu1 }
 0x117   :  { %v1819_v23 = vpop.f32.mrb[5].mxu1 }
 0x118   :  { %v1820_v24 = vadd.f32 %v1819_v23, %v1818_v22  ;;  %v1821_v25 = vpop.f32.mrb[6].mxu1 }
 0x119   :  { %v1822_v26 = vpop.f32.mrb[7].mxu1 }
 0x11a   :  { %v2003_v26 = vld [vmem:[%s2657_s12 + $0x8] ss:$28 sps:$4 sm:$0xff]  }
 0x159   :  { %v209_v27 = vpop.f32.mrb[0].mxu0  ;;  %v2407_v28 = vpop.f32.mrb[8].mxu1 }
 0x15a   :  { %v572_v29 = vadd.f32 %v1776_v15, %v209_v27  ;;  %v1856_v30 = vpop.f32.mrb[1].mxu0  ;;  %v1888_v31 = vpop.f32.mrb[9].mxu1  ;;  %v2030_v15 = vld [vmem:[%s2657_s12 + $0x118] ss:$28 sps:$4 sm:$0xff]  }
 0x15b   :  { %v212_v32 = vpop.f32.mrb[2].mxu0  ;;  %v871_v33 = vpop.f32.mrb[10].mxu1  ;;  %v2017_v30 = vld [vmem:[%s2657_s12 + $0x7c] ss:$28 sps:$4 sm:$0xff]  }
 0x15c   :  { %v1857_v34 = vpop.f32.mrb[3].mxu0  ;;  %v1889_v35 = vpop.f32.mrb[11].mxu1  ;;  %v2015_v31 = vld [vmem:[%s2657_s12 + $0x78] ss:$28 sps:$4 sm:$0xff]   ;;  %v2021_v33 = vld [vmem:[%s2657_s12 + $0xb0] ss:$28 sps:$4 sm:$0xff]  }
 0x15d   :  { %v2023_v32 = vld [vmem:[%s2657_s12 + $0xb4] ss:$28 sps:$4 sm:$0xff]   ;;  %v2029_v34 = vld [vmem:[%s2657_s12 + $0xec] ss:$28 sps:$4 sm:$0xff]  }
 0x15e   :  { %v2027_v35 = vld [vmem:[%s2657_s12 + $0xe8] ss:$28 sps:$4 sm:$0xff]  }
 0x179   :  { %v1796_v36 = vpop.f32.mrb[4].mxu0 }
 0x17a   :  { %v1797_v37 = vpop.f32.mrb[5].mxu0 }
 0x17b   :  { %v1798_v38 = vadd.f32 %v1797_v37, %v1796_v36  ;;  %v1799_v39 = vpop.f32.mrb[6].mxu0  ;;  %v2035_v36 = vld [vmem:[%s2657_s12 + $0x124] ss:$28 sps:$4 sm:$0xff]  }
 0x17c   :  { %v1800_v40 = vpop.f32.mrb[7].mxu0  ;;  %v2033_v37 = vld [vmem:[%s2657_s12 + $0x120] ss:$28 sps:$4 sm:$0xff]   ;;  %v2039_v39 = vld [vmem:[%s2657_s12 + $0x158] ss:$28 sps:$4 sm:$0xff]  }
 0x17d   :  { %v612_v41 = vadd.f32 %v1798_v38, %v572_v29  ;;  %v2011_v29 = vld [vmem:[%s2657_s12 + $0x44] ss:$28 sps:$4 sm:$0xff]   ;;  %v2041_v38 = vld [vmem:[%s2657_s12 + $0x15c] ss:$28 sps:$4 sm:$0xff]   ;;  %v2044_v40 = vld [vmem:[%s2657_s12 + $0x18c] ss:$28 sps:$4 sm:$0xff]  }
 0x17f   :  { %v652_v42 = vadd.f32 %v1820_v24, %v612_v41  ;;  %v2047_v41 = vld [vmem:[%s2657_s12 + $0x194] ss:$28 sps:$4 sm:$0xff]  }
 0x181   :  { %v691_v43 = vpop.f32.mrb[8].mxu0 }
 0x182   :  { %v692_v45 = vadd.f32 %v691_v43, %v652_v42  ;;  %v1862_v47 = vpop.f32.mrb[9].mxu0  ;;  %v2042_v42 = vld [vmem:[%s2657_s12 + $0x188] ss:$28 sps:$4 sm:$0xff]   ;;  %v2045_v43 = vld [vmem:[%s2657_s12 + $0x190] ss:$28 sps:$4 sm:$0xff]  }
 0x183   :  { %v694_v48 = vpop.f32.mrb[10].mxu0 }
 0x184   :  { %v704_v49 = vadd.f32 %v1673_v44, %v692_v45  ;;  %v1863_v50 = vpop.f32.mrb[11].mxu0  ;;  %v2050_v44 = vld [vmem:[%s2657_s12 + $0x14] ss:$28 sps:$4 sm:$0xff]   ;;  %v1689_v45 = vld [vmem:[%s2659_s11] ss:$0 sm:$0xff] }
 0x186   :  { %v705_v51 = vmax.f32 %v704_v49, 0.0 }
 0x188   :  { %v706_v52 = vpack.c.bf16 %v705_v51, %v705_v51 }
 0x18a   :  { %1881 = vmatmul.mubr.bf16.vlgmr.msra.gmra.mrb[12].mxu0 %v706_v52 }
 0x18b   :  { %1902 = vmatprep.mubr.msk.bf16.mxu0 %vm2110_vm0, %v2109_v2  ;;  %1899 = vmatpush3.bf16.msra.mxu0 %v1998_v63  ;;  %v2063_v63 = vld [vmem:[%s2657_s12 + $0xc0] ss:$28 sps:$4 sm:$0xff]  }
 0x18c   :  { %1900 = vmatprep.subr.bf16.mxu0 %v2109_v2 }
 0x18f   :  { %1901 = vmatpush3.bf16.msra.mxu0 %v1999_v1  ;;  %v2066_v1 = vld [vmem:[%s2657_s12 + $0xf4] ss:$28 sps:$4 sm:$0xff]  }
 0x190   :  { %1438 = vmatprep.subr.bf16.mxu0 %v2005_v5  ;;  %v2070_v5 = vld [vmem:[%s2657_s12 + $0x12c] ss:$28 sps:$4 sm:$0xff]  }
 0x25d   :  { %v812_v56 = vpop.f32.mrb[12].mxu0 }
 0x25e   :  { %v813_v57 = vadd.f32 %v1674_v55, %v812_v56  ;;  %v1882_v58 = vpop.f32.mrb[13].mxu0  ;;  %v2054_v56 = vld [vmem:[%s2657_s12 + $0x4c] ss:$28 sps:$4 sm:$0xff]  }
 0x25f   :  { %v815_v59 = vpop.f32.mrb[14].mxu0  ;;  %v2055_v58 = vld [vmem:[%s2657_s12 + $0x50] ss:$28 sps:$4 sm:$0xff]  }
 0x260   :  { %v818_v60 = vmax.f32 %v813_v57, 0.0  ;;  %v1883_v61 = vpop.f32.mrb[15].mxu0  ;;  %v2052_v57 = vld [vmem:[%s2657_s12 + $0x48] ss:$28 sps:$4 sm:$0xff]  }
 0x261   :  { %v2058_v59 = vld [vmem:[%s2657_s12 + $0x84] ss:$28 sps:$4 sm:$0xff]  }
 0x262   :  { %v819_v62 = vpack.c.bf16 %v818_v60, %v818_v60  ;;  %v2056_v60 = vld [vmem:[%s2657_s12 + $0x80] ss:$28 sps:$4 sm:$0xff]   ;;  %v2059_v61 = vld [vmem:[%s2657_s12 + $0x88] ss:$28 sps:$4 sm:$0xff]  }
 0x264   :  { %1895 = vmatmul.mubr.msk.bf16.vlgmr.msra.gmra.mrb[12].mxu1 %vm886_vm5, %v819_v62  ;;  %v2060_v62 = vld [vmem:[%s2657_s12 + $0xb8] ss:$28 sps:$4 sm:$0xff]  }
 0x265   :  { %1429 = vmatprep.mubr.bf16.mxu1 %v2108_v0  ;;  %1398 = vmatpush1.bf16.msra.mxu1 %v2000_v3  ;;  %v2064_v3 = vld [vmem:[%s2657_s12 + $0xf0] ss:$28 sps:$4 sm:$0xff]  }
 0x266   :  { %1399 = vmatprep.subr.bf16.mxu1 %v2008_v6  ;;  %v2068_v6 = vld [vmem:[%s2657_s12 + $0x128] ss:$28 sps:$4 sm:$0xff]  }
 0x269   :  { %1400 = vmatpush1.bf16.msra.mxu1 %v2006_v7  ;;  %v2071_v7 = vld [vmem:[%s2657_s12 + $0x130] ss:$28 sps:$4 sm:$0xff]  }
 0x26a   :  { %1401 = vmatprep.subr.bf16.mxu1 %v2014_v8  ;;  %v2074_v8 = vld [vmem:[%s2657_s12 + $0x164] ss:$28 sps:$4 sm:$0xff]  }
 0x26d   :  { %1402 = vmatpush1.bf16.msra.mxu1 %v2012_v9  ;;  %v2072_v9 = vld [vmem:[%s2657_s12 + $0x160] ss:$28 sps:$4 sm:$0xff]  }
 0x26e   :  { %1403 = vmatprep.subr.bf16.mxu1 %v2020_v10  ;;  %v2075_v10 = vld [vmem:[%s2657_s12 + $0x168] ss:$28 sps:$4 sm:$0xff]  }
 0x271   :  { %1404 = vmatpush1.bf16.msra.mxu1 %v2018_v11  ;;  %v2078_v11 = vld [vmem:[%s2657_s12 + $0x19c] ss:$28 sps:$4 sm:$0xff]  }
 0x272   :  { %1405 = vmatprep.subr.bf16.mxu1 %v2026_v12  ;;  %v2076_v12 = vld [vmem:[%s2657_s12 + $0x198] ss:$28 sps:$4 sm:$0xff]  }
 0x275   :  { %1406 = vmatpush1.bf16.msra.mxu1 %v2024_v13  ;;  %v2079_v13 = vld [vmem:[%s2657_s12 + $0x1a0] ss:$28 sps:$4 sm:$0xff]  }
 0x276   :  { %1407 = vmatprep.subr.bf16.mxu1 %v2032_v14  ;;  %v1075_v14 = vshrl.u32 %v53_v46, 7 }
 0x279   :  { %1408 = vmatpush1.bf16.msra.mxu1 %v2030_v15  ;;  %v1076_v15 = vsub.s32 0, %v1075_v14 }
 0x27a   :  { %1409 = vmatprep.subr.bf16.mxu1 %v2038_v16  ;;  %v1084_v16 = vsub.s32 2, %v1075_v14 }
 0x27d   :  { %1410 = vmatpush1.bf16.msra.mxu1 %v2036_v17  ;;  %v1072_v17 = vld [vmem:[%s2660_s13] sm:$0x7f] }
 0x27e   :  { %1411 = vmatprep.subr.bf16.mxu1 %v2044_v40 }
 0x281   :  { %1412 = vmatpush1.bf16.msra.mxu1 %v2042_v42 }
 0x282   :  { %1479 = vmatprep.subr.bf16.mxu1 %v2050_v44 }
 0x337   :  { %v924_v18 = vpop.f32.mrb[12].mxu1 }
 0x338   :  { %v925_v20 = vadd.f32 %v924_v18, %v2407_v28  ;;  %v1896_v21 = vpop.f32.mrb[13].mxu1  ;;  %v2009_v28 = vld [vmem:[%s2657_s12 + $0x40] ss:$28 sps:$4 sm:$0xff]   ;;  %v1080_v18 = vsub.s32 1, %v1075_v14 }
 0x339   :  { %v927_v22 = vpop.f32.mrb[14].mxu1  ;;  %v1085_v21 = vrot.slane %v1072_v17, %v1084_v16 }
 0x33a   :  { %v937_v23 = vadd.f32 %v1688_v19, %v925_v20  ;;  %v1897_v24 = vpop.f32.mrb[15].mxu1  ;;  %v1088_v19 = vsub.s32 3, %v1075_v14  ;;  %v1077_v20 = vrot.slane %v1072_v17, %v1076_v15  ;;  %v1081_v22 = vrot.slane %v1072_v17, %v1080_v18 }
 0x33c   :  { %v938_v25 = vmax.f32 %v937_v23, 0.0  ;;  %v1089_v23 = vrot.slane %v1072_v17, %v1088_v19 }
 0x33e   :  { %v939_v27 = vpack.c.bf16 %v938_v25, %v938_v25 }
 0x340   :  { %1903 = vmatmul.mubr.msk.bf16.vlgmr.msra.gmra.mrb[16].mxu0 %vm886_vm5, %v939_v27 }
 0x341   :  { %1439 = vmatpush1.bf16.msra.mxu0 %v2003_v26  ;;  %1470 = vmatprep.mubr.bf16.mxu0 %v2108_v0 }
 0x342   :  { %1440 = vmatprep.subr.bf16.mxu0 %v2011_v29 }
 0x345   :  { %1441 = vmatpush1.bf16.msra.mxu0 %v2009_v28 }
 0x346   :  { %1442 = vmatprep.subr.bf16.mxu0 %v2017_v30 }
 0x349   :  { %1443 = vmatpush1.bf16.msra.mxu0 %v2015_v31 }
 0x34a   :  { %1444 = vmatprep.subr.bf16.mxu0 %v2023_v32 }
 0x34d   :  { %1445 = vmatpush1.bf16.msra.mxu0 %v2021_v33 }
 0x34e   :  { %1446 = vmatprep.subr.bf16.mxu0 %v2029_v34 }
 0x351   :  { %1447 = vmatpush1.bf16.msra.mxu0 %v2027_v35 }
 0x352   :  { %1448 = vmatprep.subr.bf16.mxu0 %v2035_v36 }
 0x355   :  { %1449 = vmatpush1.bf16.msra.mxu0 %v2033_v37 }
 0x356   :  { %1450 = vmatprep.subr.bf16.mxu0 %v2041_v38 }
 0x359   :  { %1451 = vmatpush1.bf16.msra.mxu0 %v2039_v39 }
 0x35a   :  { %1452 = vmatprep.subr.bf16.mxu0 %v2047_v41 }
 0x35d   :  { %1453 = vmatpush1.bf16.msra.mxu0 %v2045_v43 }
 0x35e   :  { %1906 = vmatprep.subr.bf16.mxu0 %v2109_v2 }
 0x413   :  { %v1000_v47 = vpop.f32.mrb[16].mxu0 }
 0x414   :  { %v1001_v48 = vadd.f32 %v1689_v45, %v1000_v47  ;;  %v1904_v49 = vpop.f32.mrb[17].mxu0  ;;  %v1092_v47 = vsub.s32 4, %v1075_v14 }
 0x415   :  { %v1003_v50 = vpop.f32.mrb[18].mxu0  ;;  %v1096_v49 = vsub.s32 5, %v1075_v14 }
 0x416   :  { %v1006_v51 = vmax.f32 %v1001_v48, 0.0  ;;  %v1905_v52 = vpop.f32.mrb[19].mxu0  ;;  %v1100_v48 = vsub.s32 6, %v1075_v14 }
 0x417   :  { %v1093_v52 = vrot.slane %v1072_v17, %v1092_v47 }
 0x418   :  { %v1007_v55 = vpack.c.bf16 %v1006_v51, %v1006_v51 }
 0x41a   :  { %1430 = vmatmul.mubr.bf16.vlgmr.msra.gmra.mrb[16].mxu1 %v1007_v55  ;;  %1471 = vmatmul.mubr.bf16.vlgmr.msra.gmra.mrb[20].mxu0 %v1007_v55 }
 0x41b   :  { %1480 = vmatpush1.bf16.msra.mxu1 %v2048_v53  ;;  %1907 = vmatpush3.bf16.msra.mxu0 %v2051_v54  ;;  %v1101_v53 = vrot.slane %v1072_v17, %v1100_v48 }
 0x41c   :  { %1481 = vmatprep.subr.bf16.mxu1 %v2054_v56  ;;  %1908 = vmatprep.subr.bf16.mxu0 %v2109_v2 }
 0x41d   :  { %1511 = vmatprep.mubr.bf16.mxu1 %v2108_v0  ;;  %1922 = vmatprep.mubr.msk.bf16.mxu0 %vm2110_vm0, %v2109_v2  ;;  %v2062_v0 = vld [vmem:[%s2657_s12 + $0xbc] ss:$28 sps:$4 sm:$0xff]  }
 0x41f   :  { %1482 = vmatpush1.bf16.msra.mxu1 %v2052_v57  ;;  %1909 = vmatpush3.bf16.msra.mxu0 %v2055_v58 }
 0x420   :  { %1483 = vmatprep.subr.bf16.mxu1 %v2058_v59  ;;  %1910 = vmatprep.subr.bf16.mxu0 %v2109_v2 }
 0x423   :  { %1484 = vmatpush1.bf16.msra.mxu1 %v2056_v60  ;;  %1911 = vmatpush3.bf16.msra.mxu0 %v2059_v61 }
 0x424   :  { %1485 = vmatprep.subr.bf16.mxu1 %v2062_v0  ;;  %1912 = vmatprep.subr.bf16.mxu0 %v2109_v2 }
 0x427   :  { %1486 = vmatpush1.bf16.msra.mxu1 %v2060_v62  ;;  %1913 = vmatpush3.bf16.msra.mxu0 %v2063_v63 }
 0x428   :  { %1487 = vmatprep.subr.bf16.mxu1 %v2066_v1  ;;  %1914 = vmatprep.subr.bf16.mxu0 %v2109_v2 }
 0x42b   :  { %1488 = vmatpush1.bf16.msra.mxu1 %v2064_v3  ;;  %1915 = vmatpush3.bf16.msra.mxu0 %v2067_v4 }
 0x42c   :  { %1489 = vmatprep.subr.bf16.mxu1 %v2070_v5  ;;  %1916 = vmatprep.subr.bf16.mxu0 %v2109_v2 }
 0x42f   :  { %1490 = vmatpush1.bf16.msra.mxu1 %v2068_v6  ;;  %1917 = vmatpush3.bf16.msra.mxu0 %v2071_v7 }
 0x430   :  { %1491 = vmatprep.subr.bf16.mxu1 %v2074_v8  ;;  %1918 = vmatprep.subr.bf16.mxu0 %v2109_v2 }
 0x433   :  { %1492 = vmatpush1.bf16.msra.mxu1 %v2072_v9  ;;  %1919 = vmatpush3.bf16.msra.mxu0 %v2075_v10 }
 0x434   :  { %1493 = vmatprep.subr.bf16.mxu1 %v2078_v11  ;;  %1920 = vmatprep.subr.bf16.mxu0 %v2109_v2 }
 0x437   :  { %1494 = vmatpush1.bf16.msra.mxu1 %v2076_v12  ;;  %1921 = vmatpush3.bf16.msra.mxu0 %v2079_v13 }
 0x43a   :  { %1512 = vmatmul.mubr.bf16.vlgmr.msra.gmra.mrb[20].mxu1 %v1007_v55  ;;  %1923 = vmatmul.mubr.bf16.vlgmr.msra.gmra.mrb[24].mxu0 %v1007_v55  ;;  %v1097_v55 = vrot.slane %v1072_v17, %v1096_v49 }
 0x4ed   :  { %v1431_v24 = vpop.f32.mrb[16].mxu1  ;;  %v1472_v2 = vpop.f32.mrb[20].mxu0 }
 0x4ee   :  { %v1432_v25 = vadd.f32 %v1431_v24, %v1077_v20  ;;  %v1473_v26 = vadd.f32 %v1472_v2, %v1085_v21  ;;  %v1433_v27 = vpop.f32.mrb[17].mxu1  ;;  %v1474_v29 = vpop.f32.mrb[21].mxu0 }
 0x4ef   :  { %v1434_v28 = vadd.f32 %v1433_v27, %v1081_v22  ;;  %v1475_v46 = vadd.f32 %v1474_v29, %v1089_v23  ;;  %v1435_v30 = vpop.f32.mrb[18].mxu1  ;;  %v1476_v31 = vpop.f32.mrb[22].mxu0 }
 0x4f0   :  { %v1749_v32 = vmul.f32 -1.442695, %v1432_v25  ;;  %v1751_v33 = vmul.f32 -1.442695, %v1473_v26  ;;  %v1436_v34 = vpop.f32.mrb[19].mxu1  ;;  %v1477_v35 = vpop.f32.mrb[23].mxu0 }
 0x4f1   :  { %v1750_v36 = vmul.f32 -1.442695, %v1434_v28  ;;  %v1752_v37 = vmul.f32 -1.442695, %v1475_v46 }
 0x4f2   :  { %2080 = vpow2.f32 %v1749_v32 }
 0x4f3   :  { %2082 = vpow2.f32 %v1751_v33 }
 0x4f4   :  { %2084 = vpow2.f32 %v1750_v36 }
 0x4f5   :  { %2086 = vpow2.f32 %v1752_v37 }
 0x4fc   :  { %v2081_v38 = vpop.eup %2080 }
 0x4fd   :  { %v2083_v39 = vpop.eup %2082  ;;  %v1581_v40 = vadd.f32 1.0, %v2081_v38 }
 0x4fe   :  { %v2085_v41 = vpop.eup %2084  ;;  %v1583_v42 = vadd.f32 1.0, %v2083_v39 }
 0x4ff   :  { %v2087_v43 = vpop.eup %2086  ;;  %2088 = vrcp.f32 %v1581_v40  ;;  %v1582_v44 = vadd.f32 1.0, %v2085_v41 }
 0x500   :  { %2090 = vrcp.f32 %v1583_v42  ;;  %v1584_v45 = vadd.f32 1.0, %v2087_v43 }
 0x501   :  { %2092 = vrcp.f32 %v1582_v44 }
 0x502   :  { %2094 = vrcp.f32 %v1584_v45 }
 0x509   :  { %v2089_v50 = vpop.eup %2088 }
 0x50a   :  { %v2091_v51 = vpop.eup %2090  ;;  %1602 = vst [vmem:[%s2661_s14] sm:$0xff] %v2089_v50 }
 0x50b   :  { %v2093_v54 = vpop.eup %2092  ;;  %1604 = vst [vmem:[%s2661_s14 + $0x10] sm:$0xff] %v2091_v51 }
 0x50c   :  { %v2095_v56 = vpop.eup %2094  ;;  %1603 = vst [vmem:[%s2661_s14 + $0x8] sm:$0xff] %v2093_v54 }
 0x50d   :  { %1605 = vst [vmem:[%s2661_s14 + $0x18] sm:$0xff] %v2095_v56  ;;  %v1513_v57 = vpop.f32.mrb[20].mxu1  ;;  %v1554_v58 = vpop.f32.mrb[24].mxu0 }
 0x50e   :  { %v1514_v59 = vadd.f32 %v1513_v57, %v1093_v52  ;;  %v1555_v60 = vadd.f32 %v1554_v58, %v1101_v53  ;;  %v1515_v61 = vpop.f32.mrb[21].mxu1  ;;  %v1924_v0 = vpop.f32.mrb[25].mxu0 }
 0x50f   :  { %v1516_v62 = vadd.f32 %v1515_v61, %v1097_v55  ;;  %v1517_v63 = vpop.f32.mrb[22].mxu1  ;;  %v1557_v1 = vpop.f32.mrb[26].mxu0 }
 0x510   :  { %v1753_v3 = vmul.f32 -1.442695, %v1514_v59  ;;  %v1755_v4 = vmul.f32 -1.442695, %v1555_v60  ;;  %v1518_v5 = vpop.f32.mrb[23].mxu1  ;;  %v1925_v6 = vpop.f32.mrb[27].mxu0 }
 0x511   :  { %v1754_v7 = vmul.f32 -1.442695, %v1516_v62 }
 0x512   :  { %2096 = vpow2.f32 %v1753_v3 }
 0x513   :  { %2098 = vpow2.f32 %v1755_v4 }
 0x514   :  { %2100 = vpow2.f32 %v1754_v7 }
 0x51c   :  { %v2097_v8 = vpop.eup %2096 }
 0x51d   :  { %v2099_v9 = vpop.eup %2098  ;;  %v1585_v10 = vadd.f32 1.0, %v2097_v8 }
 0x51e   :  { %v2101_v11 = vpop.eup %2100  ;;  %v1587_v12 = vadd.f32 1.0, %v2099_v9 }
 0x51f   :  { %2102 = vrcp.f32 %v1585_v10  ;;  %v1586_v13 = vadd.f32 1.0, %v2101_v11 }
 0x520   :  { %2104 = vrcp.f32 %v1587_v12 }
 0x521   :  { %2106 = vrcp.f32 %v1586_v13 }
 0x529   :  { %v2103_v14 = vpop.eup %2102 }
 0x52a   :  { %v2105_v15 = vpop.eup %2104  ;;  %1606 = vst [vmem:[%s2661_s14 + $0x20] sm:$0xff] %v2103_v14 }
 0x52b   :  { %v2107_v16 = vpop.eup %2106  ;;  %1608 = vst.msk [vmem:[%s2661_s14 + $0x30] sm:$0xff] %vm533_vm4, %v2105_v15 }
 0x52c   :  { %1607 = vst [vmem:[%s2661_s14 + $0x28] sm:$0xff] %v2107_v16 }

</bundles_post_ra>
